<compile_context>
chip_gen: v7x
topology: tpu7x:2x2x1
jax: 0.10.0
libtpu: 0.0.40
codegen_flags: <defaults>
</compile_context>

<pallas_src>
import jax
import jax.numpy as jnp
import numpy as np
from jax.experimental import pallas as pl
from jax.experimental.pallas import tpu as pltpu


def _make_encoder_lstm_kernel(T, Bp, H):
    """Single-invocation kernel: full sequence in VMEM, unrolled reverse-time loop."""

    def kernel(x_ref, w_ih_ref, w_hh_ref, b_ref, w_lin_ref, b_lin_ref, out_ref):
        # One MXU matmul for the input projection of ALL timesteps, bias fused once.
        #   x_ref    : (T*Bp, in_dim+1)
        #   w_ih_ref : (in_dim+1, 4H)
        #   b_ref    : (1, 4H)
        xp = (jnp.dot(x_ref[...], w_ih_ref[...], preferred_element_type=jnp.float32)
              + b_ref[...])                                   # (T*Bp, 4H)

        w_hh = w_hh_ref[...]                                  # (H, 4H), loaded once
        h = jnp.zeros((Bp, H), jnp.float32)
        c = jnp.zeros((Bp, H), jnp.float32)

        # Reverse-time recurrence, fully unrolled (T small & static). Per step:
        # one small MXU matmul + one full-vreg sigmoid + one tanh + VPU gate math.
        for s in range(T):
            idx = T - 1 - s
            gates = (xp[idx * Bp:(idx + 1) * Bp, :]
                     + jnp.dot(h, w_hh, preferred_element_type=jnp.float32))  # (Bp, 4H)

            # PyTorch gate ordering: i, f, g, o.
            # Apply sigmoid to the whole gate block in one EUP pass, then slice;
            # tanh only on the candidate (g) chunk.
            sig = jax.nn.sigmoid(gates)                       # (Bp, 4H)
            i_g = sig[:, 0 * H:1 * H]
            f_g = sig[:, 1 * H:2 * H]
            g_g = jnp.tanh(gates[:, 2 * H:3 * H])
            o_g = sig[:, 3 * H:4 * H]

            c = f_g * c + i_g * g_g
            h = o_g * jnp.tanh(c)

        # Final linear head; output is lane-padded to 128 so the store is unmasked.
        out_ref[...] = (jnp.dot(h, w_lin_ref[...], preferred_element_type=jnp.float32)
                        + b_lin_ref[...])

    return kernel


def encoder_lstm_forward(y, t, params):
    """y: (T, B, input_dim), t: (T, B). Returns (1, B, output_dim)."""
    T, B, _ = y.shape
    w_ih, w_hh, b_ih, b_hh, w_lin, b_lin = (
        params["w_ih"], params["w_hh"], params["b_ih"], params["b_hh"],
        params["w_lin"], params["b_lin"])
    H = w_hh.shape[1]
    out_dim = w_lin.shape[0]
    in_dim_p1 = w_ih.shape[1]

    # Pad batch to a full sublane group (8) and the output head to a full lane group (128).
    Bp = ((B + 7) // 8) * 8
    OUT_PAD = ((out_dim + 127) // 128) * 128

    # Glue in plain JAX: build y_in, pad batch, flatten time*batch, pre-transpose weights,
    # fuse the two LSTM biases, zero-pad the linear head to 128 lanes.
    y_in = jnp.concatenate([y, t[..., None]], axis=-1)              # (T, B, in+1)
    y_in_p = jnp.zeros((T, Bp, in_dim_p1), jnp.float32).at[:, :B, :].set(y_in)
    x_flat = y_in_p.reshape(T * Bp, in_dim_p1)                      # (T*Bp, in+1)

    w_ih_t = w_ih.T                                                 # (in+1, 4H)
    w_hh_t = w_hh.T                                                 # (H, 4H)
    b = (b_ih + b_hh)[None, :]                                      # (1, 4H)
    w_lin_t = jnp.zeros((H, OUT_PAD), jnp.float32).at[:, :out_dim].set(w_lin.T)
    b_lin_p = jnp.zeros((1, OUT_PAD), jnp.float32).at[:, :out_dim].set(b_lin[None, :])

    kernel = _make_encoder_lstm_kernel(T, Bp, H)

    out_p = pl.pallas_call(
        kernel,
        out_shape=jax.ShapeDtypeStruct((Bp, OUT_PAD), jnp.float32),
        # Single invocation: every operand lives whole in VMEM (tiny at these shapes).
        in_specs=[pl.BlockSpec(memory_space=pltpu.MemorySpace.VMEM)] * 6,
        out_specs=pl.BlockSpec(memory_space=pltpu.MemorySpace.VMEM),
    )(x_flat, w_ih_t, w_hh_t, b, w_lin_t, b_lin_p)

    return out_p[:B, :out_dim][None, ...]                           # (1, B, out_dim)


def reference_forward(y, t, params):
    """Pure-JAX reference mirroring the PyTorch forward exactly."""
    w_ih, w_hh, b_ih, b_hh, w_lin, b_lin = (
        params["w_ih"], params["w_hh"], params["b_ih"], params["b_hh"],
        params["w_lin"], params["b_lin"])
    H = w_hh.shape[1]
    T, B, _ = y.shape
    y_in = jnp.concatenate([y, t[..., None]], axis=-1)
    h = jnp.zeros((B, H), jnp.float32)
    c = jnp.zeros((B, H), jnp.float32)
    for ti in reversed(range(T)):
        x = y_in[ti]
        gates = x @ w_ih.T + h @ w_hh.T + b_ih + b_hh
        i_g = jax.nn.sigmoid(gates[:, 0 * H:1 * H])
        f_g = jax.nn.sigmoid(gates[:, 1 * H:2 * H])
        g_g = jnp.tanh(gates[:, 2 * H:3 * H])
        o_g = jax.nn.sigmoid(gates[:, 3 * H:4 * H])
        c = f_g * c + i_g * g_g
        h = o_g * jnp.tanh(c)
    out = h @ w_lin.T + b_lin
    return out[None, ...]


def init_params(key, input_dim, hidden_dim, output_dim):
    """Deterministic init mimicking PyTorch's U(-1/sqrt(H), 1/sqrt(H)) defaults."""
    ks = jax.random.split(key, 6)
    k_lstm = 1.0 / np.sqrt(hidden_dim)
    k_lin = 1.0 / np.sqrt(hidden_dim)
    return {
        "w_ih": jax.random.uniform(ks[0], (4 * hidden_dim, input_dim + 1),
                                   jnp.float32, -k_lstm, k_lstm),
        "w_hh": jax.random.uniform(ks[1], (4 * hidden_dim, hidden_dim),
                                   jnp.float32, -k_lstm, k_lstm),
        "b_ih": jax.random.uniform(ks[2], (4 * hidden_dim,),
                                   jnp.float32, -k_lstm, k_lstm),
        "b_hh": jax.random.uniform(ks[3], (4 * hidden_dim,),
                                   jnp.float32, -k_lstm, k_lstm),
        "w_lin": jax.random.uniform(ks[4], (output_dim, hidden_dim),
                                    jnp.float32, -k_lin, k_lin),
        "b_lin": jax.random.uniform(ks[5], (output_dim,),
                                    jnp.float32, -k_lin, k_lin),
    }


if __name__ == "__main__":
    input_dim, hidden_dim, output_dim = 4, 32, 8
    T, B = 8, 2

    key = jax.random.PRNGKey(0)
    k_y, k_t, k_p = jax.random.split(key, 3)

    y = jax.random.normal(k_y, (T, B, input_dim), jnp.float32)
    # monotone time grid, same for each batch element (like an ODE time vector)
    t = jnp.tile(jnp.linspace(0.0, 1.0, T, dtype=jnp.float32)[:, None], (1, B))

    params = init_params(k_p, input_dim, hidden_dim, output_dim)

    out = encoder_lstm_forward(y, t, params)
    out = jax.block_until_ready(out)

    ref = reference_forward(y, t, params)
    assert out.shape == (1, B, output_dim)
    np.testing.assert_allclose(np.asarray(out), np.asarray(ref), rtol=1e-5, atol=1e-5)

    print("KERNEL_OK")
</pallas_src>

<mosaic_0001>
module attributes {stable_mosaic.version = 11 : i64} {
  func.func @kernel(%arg0: memref<64x5xf32, #tpu.memory_space<vmem>>, %arg1: memref<5x128xf32, #tpu.memory_space<vmem>>, %arg2: memref<32x128xf32, #tpu.memory_space<vmem>>, %arg3: memref<1x128xf32, #tpu.memory_space<vmem>>, %arg4: memref<32x128xf32, #tpu.memory_space<vmem>>, %arg5: memref<1x128xf32, #tpu.memory_space<vmem>>, %arg6: memref<8x128xf32, #tpu.memory_space<vmem>>) attributes {dimension_semantics = [], scalar_prefetch = 0 : i64, scratch_operands = 0 : i64, tpu.core_type = #tpu.core_type<tc>} {
    %c0 = arith.constant 0 : index
    %c0_0 = arith.constant 0 : index
    %0 = vector.load %arg0[%c0, %c0_0] : memref<64x5xf32, #tpu.memory_space<vmem>>, vector<64x5xf32>
    %c0_1 = arith.constant 0 : index
    %c0_2 = arith.constant 0 : index
    %1 = vector.load %arg1[%c0_1, %c0_2] : memref<5x128xf32, #tpu.memory_space<vmem>>, vector<5x128xf32>
    %cst = arith.constant dense<0.000000e+00> : vector<64x128xf32>
    %2 = tpu.matmul %0, %1, %cst {dimension_numbers = #tpu.dot_dimension_numbers<[1], [0], [0], [1], [0, 0, 1, 1], [], []>} : vector<64x5xf32>, vector<5x128xf32>, vector<64x128xf32> -> vector<64x128xf32>
    %c0_3 = arith.constant 0 : index
    %c0_4 = arith.constant 0 : index
    %3 = vector.load %arg3[%c0_3, %c0_4] : memref<1x128xf32, #tpu.memory_space<vmem>>, vector<1x128xf32>
    %4 = vector.broadcast %3 : vector<1x128xf32> to vector<64x128xf32>
    %5 = arith.addf %2, %4 : vector<64x128xf32>
    %c0_5 = arith.constant 0 : index
    %c0_6 = arith.constant 0 : index
    %6 = vector.load %arg2[%c0_5, %c0_6] : memref<32x128xf32, #tpu.memory_space<vmem>>, vector<32x128xf32>
    %cst_7 = arith.constant 0.000000e+00 : f32
    %7 = vector.broadcast %cst_7 : f32 to vector<8x32xf32>
    %cst_8 = arith.constant 0.000000e+00 : f32
    %8 = vector.broadcast %cst_8 : f32 to vector<8x32xf32>
    %9 = vector.extract_strided_slice %5 {offsets = [56, 0], sizes = [8, 128], strides = [1, 1]} : vector<64x128xf32> to vector<8x128xf32>
    %cst_9 = arith.constant dense<0.000000e+00> : vector<8x128xf32>
    %10 = tpu.matmul %7, %6, %cst_9 {dimension_numbers = #tpu.dot_dimension_numbers<[1], [0], [0], [1], [0, 0, 1, 1], [], []>} : vector<8x32xf32>, vector<32x128xf32>, vector<8x128xf32> -> vector<8x128xf32>
    %11 = arith.addf %9, %10 : vector<8x128xf32>
    %12 = arith.negf %11 : vector<8x128xf32>
    %13 = math.exp %12 : vector<8x128xf32>
    %cst_10 = arith.constant 1.000000e+00 : f32
    %14 = vector.broadcast %cst_10 : f32 to vector<8x128xf32>
    %15 = arith.addf %14, %13 : vector<8x128xf32>
    %16 = arith.divf %14, %15 : vector<8x128xf32>
    %17 = vector.extract_strided_slice %16 {offsets = [0, 0], sizes = [8, 32], strides = [1, 1]} : vector<8x128xf32> to vector<8x32xf32>
    %18 = vector.extract_strided_slice %16 {offsets = [0, 32], sizes = [8, 32], strides = [1, 1]} : vector<8x128xf32> to vector<8x32xf32>
    %19 = vector.extract_strided_slice %11 {offsets = [0, 64], sizes = [8, 32], strides = [1, 1]} : vector<8x128xf32> to vector<8x32xf32>
    %20 = math.tanh %19 : vector<8x32xf32>
    %21 = vector.extract_strided_slice %16 {offsets = [0, 96], sizes = [8, 32], strides = [1, 1]} : vector<8x128xf32> to vector<8x32xf32>
    %22 = arith.mulf %18, %8 : vector<8x32xf32>
    %23 = arith.mulf %17, %20 : vector<8x32xf32>
    %24 = arith.addf %22, %23 : vector<8x32xf32>
    %25 = math.tanh %24 : vector<8x32xf32>
    %26 = arith.mulf %21, %25 : vector<8x32xf32>
    %27 = vector.extract_strided_slice %5 {offsets = [48, 0], sizes = [8, 128], strides = [1, 1]} : vector<64x128xf32> to vector<8x128xf32>
    %cst_11 = arith.constant dense<0.000000e+00> : vector<8x128xf32>
    %28 = tpu.matmul %26, %6, %cst_11 {dimension_numbers = #tpu.dot_dimension_numbers<[1], [0], [0], [1], [0, 0, 1, 1], [], []>} : vector<8x32xf32>, vector<32x128xf32>, vector<8x128xf32> -> vector<8x128xf32>
    %29 = arith.addf %27, %28 : vector<8x128xf32>
    %30 = arith.negf %29 : vector<8x128xf32>
    %31 = math.exp %30 : vector<8x128xf32>
    %cst_12 = arith.constant 1.000000e+00 : f32
    %32 = vector.broadcast %cst_12 : f32 to vector<8x128xf32>
    %33 = arith.addf %32, %31 : vector<8x128xf32>
    %34 = arith.divf %32, %33 : vector<8x128xf32>
    %35 = vector.extract_strided_slice %34 {offsets = [0, 0], sizes = [8, 32], strides = [1, 1]} : vector<8x128xf32> to vector<8x32xf32>
    %36 = vector.extract_strided_slice %34 {offsets = [0, 32], sizes = [8, 32], strides = [1, 1]} : vector<8x128xf32> to vector<8x32xf32>
    %37 = vector.extract_strided_slice %29 {offsets = [0, 64], sizes = [8, 32], strides = [1, 1]} : vector<8x128xf32> to vector<8x32xf32>
    %38 = math.tanh %37 : vector<8x32xf32>
    %39 = vector.extract_strided_slice %34 {offsets = [0, 96], sizes = [8, 32], strides = [1, 1]} : vector<8x128xf32> to vector<8x32xf32>
    %40 = arith.mulf %36, %24 : vector<8x32xf32>
    %41 = arith.mulf %35, %38 : vector<8x32xf32>
    %42 = arith.addf %40, %41 : vector<8x32xf32>
    %43 = math.tanh %42 : vector<8x32xf32>
    %44 = arith.mulf %39, %43 : vector<8x32xf32>
    %45 = vector.extract_strided_slice %5 {offsets = [40, 0], sizes = [8, 128], strides = [1, 1]} : vector<64x128xf32> to vector<8x128xf32>
    %cst_13 = arith.constant dense<0.000000e+00> : vector<8x128xf32>
    %46 = tpu.matmul %44, %6, %cst_13 {dimension_numbers = #tpu.dot_dimension_numbers<[1], [0], [0], [1], [0, 0, 1, 1], [], []>} : vector<8x32xf32>, vector<32x128xf32>, vector<8x128xf32> -> vector<8x128xf32>
    %47 = arith.addf %45, %46 : vector<8x128xf32>
    %48 = arith.negf %47 : vector<8x128xf32>
    %49 = math.exp %48 : vector<8x128xf32>
    %cst_14 = arith.constant 1.000000e+00 : f32
    %50 = vector.broadcast %cst_14 : f32 to vector<8x128xf32>
    %51 = arith.addf %50, %49 : vector<8x128xf32>
    %52 = arith.divf %50, %51 : vector<8x128xf32>
    %53 = vector.extract_strided_slice %52 {offsets = [0, 0], sizes = [8, 32], strides = [1, 1]} : vector<8x128xf32> to vector<8x32xf32>
    %54 = vector.extract_strided_slice %52 {offsets = [0, 32], sizes = [8, 32], strides = [1, 1]} : vector<8x128xf32> to vector<8x32xf32>
    %55 = vector.extract_strided_slice %47 {offsets = [0, 64], sizes = [8, 32], strides = [1, 1]} : vector<8x128xf32> to vector<8x32xf32>
    %56 = math.tanh %55 : vector<8x32xf32>
    %57 = vector.extract_strided_slice %52 {offsets = [0, 96], sizes = [8, 32], strides = [1, 1]} : vector<8x128xf32> to vector<8x32xf32>
    %58 = arith.mulf %54, %42 : vector<8x32xf32>
    %59 = arith.mulf %53, %56 : vector<8x32xf32>
    %60 = arith.addf %58, %59 : vector<8x32xf32>
    %61 = math.tanh %60 : vector<8x32xf32>
    %62 = arith.mulf %57, %61 : vector<8x32xf32>
    %63 = vector.extract_strided_slice %5 {offsets = [32, 0], sizes = [8, 128], strides = [1, 1]} : vector<64x128xf32> to vector<8x128xf32>
    %cst_15 = arith.constant dense<0.000000e+00> : vector<8x128xf32>
    %64 = tpu.matmul %62, %6, %cst_15 {dimension_numbers = #tpu.dot_dimension_numbers<[1], [0], [0], [1], [0, 0, 1, 1], [], []>} : vector<8x32xf32>, vector<32x128xf32>, vector<8x128xf32> -> vector<8x128xf32>
    %65 = arith.addf %63, %64 : vector<8x128xf32>
    %66 = arith.negf %65 : vector<8x128xf32>
    %67 = math.exp %66 : vector<8x128xf32>
    %cst_16 = arith.constant 1.000000e+00 : f32
    %68 = vector.broadcast %cst_16 : f32 to vector<8x128xf32>
    %69 = arith.addf %68, %67 : vector<8x128xf32>
    %70 = arith.divf %68, %69 : vector<8x128xf32>
    %71 = vector.extract_strided_slice %70 {offsets = [0, 0], sizes = [8, 32], strides = [1, 1]} : vector<8x128xf32> to vector<8x32xf32>
    %72 = vector.extract_strided_slice %70 {offsets = [0, 32], sizes = [8, 32], strides = [1, 1]} : vector<8x128xf32> to vector<8x32xf32>
    %73 = vector.extract_strided_slice %65 {offsets = [0, 64], sizes = [8, 32], strides = [1, 1]} : vector<8x128xf32> to vector<8x32xf32>
    %74 = math.tanh %73 : vector<8x32xf32>
    %75 = vector.extract_strided_slice %70 {offsets = [0, 96], sizes = [8, 32], strides = [1, 1]} : vector<8x128xf32> to vector<8x32xf32>
    %76 = arith.mulf %72, %60 : vector<8x32xf32>
    %77 = arith.mulf %71, %74 : vector<8x32xf32>
    %78 = arith.addf %76, %77 : vector<8x32xf32>
    %79 = math.tanh %78 : vector<8x32xf32>
    %80 = arith.mulf %75, %79 : vector<8x32xf32>
    %81 = vector.extract_strided_slice %5 {offsets = [24, 0], sizes = [8, 128], strides = [1, 1]} : vector<64x128xf32> to vector<8x128xf32>
    %cst_17 = arith.constant dense<0.000000e+00> : vector<8x128xf32>
    %82 = tpu.matmul %80, %6, %cst_17 {dimension_numbers = #tpu.dot_dimension_numbers<[1], [0], [0], [1], [0, 0, 1, 1], [], []>} : vector<8x32xf32>, vector<32x128xf32>, vector<8x128xf32> -> vector<8x128xf32>
    %83 = arith.addf %81, %82 : vector<8x128xf32>
    %84 = arith.negf %83 : vector<8x128xf32>
    %85 = math.exp %84 : vector<8x128xf32>
    %cst_18 = arith.constant 1.000000e+00 : f32
    %86 = vector.broadcast %cst_18 : f32 to vector<8x128xf32>
    %87 = arith.addf %86, %85 : vector<8x128xf32>
    %88 = arith.divf %86, %87 : vector<8x128xf32>
    %89 = vector.extract_strided_slice %88 {offsets = [0, 0], sizes = [8, 32], strides = [1, 1]} : vector<8x128xf32> to vector<8x32xf32>
    %90 = vector.extract_strided_slice %88 {offsets = [0, 32], sizes = [8, 32], strides = [1, 1]} : vector<8x128xf32> to vector<8x32xf32>
    %91 = vector.extract_strided_slice %83 {offsets = [0, 64], sizes = [8, 32], strides = [1, 1]} : vector<8x128xf32> to vector<8x32xf32>
    %92 = math.tanh %91 : vector<8x32xf32>
    %93 = vector.extract_strided_slice %88 {offsets = [0, 96], sizes = [8, 32], strides = [1, 1]} : vector<8x128xf32> to vector<8x32xf32>
    %94 = arith.mulf %90, %78 : vector<8x32xf32>
    %95 = arith.mulf %89, %92 : vector<8x32xf32>
    %96 = arith.addf %94, %95 : vector<8x32xf32>
    %97 = math.tanh %96 : vector<8x32xf32>
    %98 = arith.mulf %93, %97 : vector<8x32xf32>
    %99 = vector.extract_strided_slice %5 {offsets = [16, 0], sizes = [8, 128], strides = [1, 1]} : vector<64x128xf32> to vector<8x128xf32>
    %cst_19 = arith.constant dense<0.000000e+00> : vector<8x128xf32>
    %100 = tpu.matmul %98, %6, %cst_19 {dimension_numbers = #tpu.dot_dimension_numbers<[1], [0], [0], [1], [0, 0, 1, 1], [], []>} : vector<8x32xf32>, vector<32x128xf32>, vector<8x128xf32> -> vector<8x128xf32>
    %101 = arith.addf %99, %100 : vector<8x128xf32>
    %102 = arith.negf %101 : vector<8x128xf32>
    %103 = math.exp %102 : vector<8x128xf32>
    %cst_20 = arith.constant 1.000000e+00 : f32
    %104 = vector.broadcast %cst_20 : f32 to vector<8x128xf32>
    %105 = arith.addf %104, %103 : vector<8x128xf32>
    %106 = arith.divf %104, %105 : vector<8x128xf32>
    %107 = vector.extract_strided_slice %106 {offsets = [0, 0], sizes = [8, 32], strides = [1, 1]} : vector<8x128xf32> to vector<8x32xf32>
    %108 = vector.extract_strided_slice %106 {offsets = [0, 32], sizes = [8, 32], strides = [1, 1]} : vector<8x128xf32> to vector<8x32xf32>
    %109 = vector.extract_strided_slice %101 {offsets = [0, 64], sizes = [8, 32], strides = [1, 1]} : vector<8x128xf32> to vector<8x32xf32>
    %110 = math.tanh %109 : vector<8x32xf32>
    %111 = vector.extract_strided_slice %106 {offsets = [0, 96], sizes = [8, 32], strides = [1, 1]} : vector<8x128xf32> to vector<8x32xf32>
    %112 = arith.mulf %108, %96 : vector<8x32xf32>
    %113 = arith.mulf %107, %110 : vector<8x32xf32>
    %114 = arith.addf %112, %113 : vector<8x32xf32>
    %115 = math.tanh %114 : vector<8x32xf32>
    %116 = arith.mulf %111, %115 : vector<8x32xf32>
    %117 = vector.extract_strided_slice %5 {offsets = [8, 0], sizes = [8, 128], strides = [1, 1]} : vector<64x128xf32> to vector<8x128xf32>
    %cst_21 = arith.constant dense<0.000000e+00> : vector<8x128xf32>
    %118 = tpu.matmul %116, %6, %cst_21 {dimension_numbers = #tpu.dot_dimension_numbers<[1], [0], [0], [1], [0, 0, 1, 1], [], []>} : vector<8x32xf32>, vector<32x128xf32>, vector<8x128xf32> -> vector<8x128xf32>
    %119 = arith.addf %117, %118 : vector<8x128xf32>
    %120 = arith.negf %119 : vector<8x128xf32>
    %121 = math.exp %120 : vector<8x128xf32>
    %cst_22 = arith.constant 1.000000e+00 : f32
    %122 = vector.broadcast %cst_22 : f32 to vector<8x128xf32>
    %123 = arith.addf %122, %121 : vector<8x128xf32>
    %124 = arith.divf %122, %123 : vector<8x128xf32>
    %125 = vector.extract_strided_slice %124 {offsets = [0, 0], sizes = [8, 32], strides = [1, 1]} : vector<8x128xf32> to vector<8x32xf32>
    %126 = vector.extract_strided_slice %124 {offsets = [0, 32], sizes = [8, 32], strides = [1, 1]} : vector<8x128xf32> to vector<8x32xf32>
    %127 = vector.extract_strided_slice %119 {offsets = [0, 64], sizes = [8, 32], strides = [1, 1]} : vector<8x128xf32> to vector<8x32xf32>
    %128 = math.tanh %127 : vector<8x32xf32>
    %129 = vector.extract_strided_slice %124 {offsets = [0, 96], sizes = [8, 32], strides = [1, 1]} : vector<8x128xf32> to vector<8x32xf32>
    %130 = arith.mulf %126, %114 : vector<8x32xf32>
    %131 = arith.mulf %125, %128 : vector<8x32xf32>
    %132 = arith.addf %130, %131 : vector<8x32xf32>
    %133 = math.tanh %132 : vector<8x32xf32>
    %134 = arith.mulf %129, %133 : vector<8x32xf32>
    %135 = vector.extract_strided_slice %5 {offsets = [0, 0], sizes = [8, 128], strides = [1, 1]} : vector<64x128xf32> to vector<8x128xf32>
    %cst_23 = arith.constant dense<0.000000e+00> : vector<8x128xf32>
    %136 = tpu.matmul %134, %6, %cst_23 {dimension_numbers = #tpu.dot_dimension_numbers<[1], [0], [0], [1], [0, 0, 1, 1], [], []>} : vector<8x32xf32>, vector<32x128xf32>, vector<8x128xf32> -> vector<8x128xf32>
    %137 = arith.addf %135, %136 : vector<8x128xf32>
    %138 = arith.negf %137 : vector<8x128xf32>
    %139 = math.exp %138 : vector<8x128xf32>
    %cst_24 = arith.constant 1.000000e+00 : f32
    %140 = vector.broadcast %cst_24 : f32 to vector<8x128xf32>
    %141 = arith.addf %140, %139 : vector<8x128xf32>
    %142 = arith.divf %140, %141 : vector<8x128xf32>
    %143 = vector.extract_strided_slice %142 {offsets = [0, 0], sizes = [8, 32], strides = [1, 1]} : vector<8x128xf32> to vector<8x32xf32>
    %144 = vector.extract_strided_slice %142 {offsets = [0, 32], sizes = [8, 32], strides = [1, 1]} : vector<8x128xf32> to vector<8x32xf32>
    %145 = vector.extract_strided_slice %137 {offsets = [0, 64], sizes = [8, 32], strides = [1, 1]} : vector<8x128xf32> to vector<8x32xf32>
    %146 = math.tanh %145 : vector<8x32xf32>
    %147 = vector.extract_strided_slice %142 {offsets = [0, 96], sizes = [8, 32], strides = [1, 1]} : vector<8x128xf32> to vector<8x32xf32>
    %148 = arith.mulf %144, %132 : vector<8x32xf32>
    %149 = arith.mulf %143, %146 : vector<8x32xf32>
    %150 = arith.addf %148, %149 : vector<8x32xf32>
    %151 = math.tanh %150 : vector<8x32xf32>
    %152 = arith.mulf %147, %151 : vector<8x32xf32>
    %c0_25 = arith.constant 0 : index
    %c0_26 = arith.constant 0 : index
    %153 = vector.load %arg4[%c0_25, %c0_26] : memref<32x128xf32, #tpu.memory_space<vmem>>, vector<32x128xf32>
    %cst_27 = arith.constant dense<0.000000e+00> : vector<8x128xf32>
    %154 = tpu.matmul %152, %153, %cst_27 {dimension_numbers = #tpu.dot_dimension_numbers<[1], [0], [0], [1], [0, 0, 1, 1], [], []>} : vector<8x32xf32>, vector<32x128xf32>, vector<8x128xf32> -> vector<8x128xf32>
    %c0_28 = arith.constant 0 : index
    %c0_29 = arith.constant 0 : index
    %155 = vector.load %arg5[%c0_28, %c0_29] : memref<1x128xf32, #tpu.memory_space<vmem>>, vector<1x128xf32>
    %156 = vector.broadcast %155 : vector<1x128xf32> to vector<8x128xf32>
    %157 = arith.addf %154, %156 : vector<8x128xf32>
    %c0_30 = arith.constant 0 : index
    %c0_31 = arith.constant 0 : index
    %158 = vector.load %arg6[%c0_30, %c0_31] : memref<8x128xf32, #tpu.memory_space<vmem>>, vector<8x128xf32>
    tpu.vector_store %arg6[%c0_30, %c0_31], %157 {strides = array<i32>} : memref<8x128xf32, #tpu.memory_space<vmem>>, vector<8x128xf32>,
    return
  }
}

</mosaic_0001>

<bundles_post_ra>
// kernel: tpu_custom_call.1
= control target key start
LH: loop header
LB: loop body
LE: loop exit
PB: predicated region body
PF: predicated region fallthrough
CT: control target
= control target key end

     0   :  { %vm65_vm0 = vcmask 1044480   ;;  %vm40_vm1 = vcmask 39936   ;;  %v1420_v5 = vmov 0.0|0.0   ;;  %vm1421_vm2 = vmmov 0   ;;  %s1653_s0 = inlined_call_operand.vmem [shape: f32[64,5], index: 0, kind: input, shape index: {}]   ;;  %s1654_s1 = inlined_call_operand.vmem [shape: f32[5,128], index: 1, kind: input, shape index: {}]   ;;  %s1655_s2 = inlined_call_operand.vmem [shape: f32[32,128], index: 2, kind: input, shape index: {}]   ;;  %s1656_s3 = inlined_call_operand.vmem [shape: f32[1,128], index: 3, kind: input, shape index: {}]   ;;  %s1657_s4 = inlined_call_operand.vmem [shape: f32[32,128], index: 4, kind: input, shape index: {}]   ;;  %s1658_s5 = inlined_call_operand.vmem [shape: f32[1,128], index: 5, kind: input, shape index: {}]   ;;  %s1659_s6 = inlined_call_operand.hbm [shape: f32[8,128], index: 6, kind: output, shape index: {}]  }
   0x1   :  { %v32_v0 = vld [vmem:[%s1654_s1] sm:$0x1f]  ;;  %v25_v2 = vld [vmem:[%s1653_s0 + $0x8] sm:$0xff]  ;;  %v26_v3 = vld [vmem:[%s1653_s0 + $0x10] sm:$0xff]  ;;  %1272 = vmatprep.subr.bf16.mxu1 %v1420_v5  ;;  %v1422_v10 = vmov 0.0  }
   0x2   :  { %v24_v1 = vld [vmem:[%s1653_s0] sm:$0xff]  ;;  %1159 = vmatprep.subr.msk.mxu0 %vm65_vm0, %v32_v0  ;;  %v175_v6 = vld [vmem:[%s1655_s2 + $0x8] sm:$0xff]  ;;  %v176_v8 = vld [vmem:[%s1655_s2 + $0x10] sm:$0xff]  ;;  %1181 = vmatprep.mubr.msk.f32.mxu1 %vm1421_vm2, %v1422_v10 }
   0x3   :  { %1161 = vmatprep.mubr.msk.f32.mxu0 %vm40_vm1, %v24_v1  ;;  %v174_v4 = vld [vmem:[%s1655_s2] sm:$0xff]  ;;  %1160 = vmatpush3.msk.msra.mxu0 %vm65_vm0, %v32_v0  ;;  %v177_v9 = vld [vmem:[%s1655_s2 + $0x18] sm:$0xff] }
   0x4   :  { %1162 = vmatmul.mubr.msk.f32.vlgmr.msra.gmra.mrb[0].mxu0 %vm40_vm1, %v25_v2  ;;  %v1482_v7 = vpack.c.bf16 %v175_v6, %v174_v4  ;;  %v27_v11 = vld [vmem:[%s1653_s0 + $0x18] sm:$0xff]  ;;  %1284 = vmatprep.subr.bf16.mxu0 %v1420_v5 }
   0x5   :  { %1164 = vmatprep.mubr.msk.f32.mxu0 %vm40_vm1, %v26_v3 }
   0x6   :  { %11 = vsyncpa [#allocation3], 0  ;;  %1274 = vmatpush3.bf16.msra.mxu1 %v1482_v7  ;;  %v28_v12 = vld [vmem:[%s1653_s0 + $0x20] sm:$0xff]  ;;  %v1501_v13 = vpack.c.bf16 %v177_v9, %v176_v8  ;;  %1286 = vmatpush3.bf16.msra.mxu0 %v1482_v7  ;;  %v29_v14 = vld [vmem:[%s1653_s0 + $0x28] sm:$0xff]  ;;  %s1424_s22 = smov 32   ;;  %vm178_vm3 = vcmask 261120  }
   0x7   :  { %1275 = vmatprep.subr.bf16.mxu1 %v1420_v5  ;;  %1287 = vmatprep.subr.bf16.mxu0 %v1420_v5  ;;  %v30_v15 = vld [vmem:[%s1653_s0 + $0x30] sm:$0xff]  ;;  %v31_v16 = vld [vmem:[%s1653_s0 + $0x38] sm:$0xff]  ;;  %v1078_v17 = vld [vmem:[%s1656_s3] ss:$0 sm:$0xff]  ;;  %s1423_s3 = smov 64  }
   0x8   :  { %1165 = vmatmul.mubr.msk.f32.gmra.mrb[2].mxu0 %vm40_vm1, %v27_v11 }
   0x9   :  { %1167 = vmatprep.mubr.msk.f32.mxu0 %vm40_vm1, %v28_v12 }
   0xa   :  { %1277 = vmatpush3.bf16.msra.mxu1 %v1501_v13  ;;  %1289 = vmatpush3.bf16.msra.mxu0 %v1501_v13 }
   0xb   :  { %1278 = vmatprep.subr.bf16.mxu1 %v1420_v5  ;;  %1296 = vmatprep.subr.bf16.mxu0 %v1420_v5 }
   0xc   :  { %1168 = vmatmul.mubr.msk.f32.gmra.mrb[4].mxu0 %vm40_vm1, %v29_v14 }
   0xd   :  { %1170 = vmatprep.mubr.msk.f32.mxu0 %vm40_vm1, %v30_v15  ;;  %1182 = vmatmul.mubr.f32.vlgmr.msra.gmra.mrb[0].mxu1 %v1422_v10 }
   0xe   :  { %1280 = vmatpush3.bf16.msra.mxu1 %v1482_v7  ;;  %1192 = vmatprep.mubr.msk.f32.mxu1 %vm1421_vm2, %v1422_v10 }
   0xf   :  { %1281 = vmatprep.subr.bf16.mxu1 %v1420_v5 }
  0x10   :  { %1171 = vmatmul.mubr.msk.f32.gmra.mrb[6].mxu0 %vm40_vm1, %v31_v16 }
  0x11   :  { %1203 = vmatprep.mubr.msk.f32.mxu0 %vm1421_vm2, %v1422_v10 }
  0x12   :  { %1283 = vmatpush3.bf16.msra.mxu1 %v1501_v13 }
  0x13   :  { %1290 = vmatprep.subr.bf16.mxu1 %v1420_v5 }
  0xd7   :  { %v1163_v18 = vpop.f32.mrb[0].mxu0 }
  0xd8   :  { %v1536_v19 = vadd.f32 %v1163_v18, %v1078_v17  ;;  %v135_v20 = vpop.f32.mrb[1].mxu0 }
  0xd9   :  { %v1538_v21 = vadd.f32 %v1078_v17, %v135_v20 }
  0xdb   :  { %v1166_v22 = vpop.f32.mrb[2].mxu0 }
  0xdc   :  { %v1540_v23 = vadd.f32 %v1166_v22, %v1078_v17  ;;  %v145_v24 = vpop.f32.mrb[3].mxu0 }
  0xdd   :  { %v1542_v25 = vadd.f32 %v1078_v17, %v145_v24 }
  0xdf   :  { %v1169_v26 = vpop.f32.mrb[4].mxu0 }
  0xe0   :  { %v1544_v27 = vadd.f32 %v1169_v26, %v1078_v17  ;;  %v155_v28 = vpop.f32.mrb[5].mxu0  ;;  %v248_v29 = vpop.f32.mrb[0].mxu1 }
  0xe1   :  { %v1546_v30 = vadd.f32 %v1078_v17, %v155_v28  ;;  %v1183_v31 = vpop.f32.mrb[1].mxu1 }
  0xe3   :  { %v1172_v32 = vpop.f32.mrb[6].mxu0 }
  0xe4   :  { %v171_v33 = vadd.f32 %v1172_v32, %v1078_v17  ;;  %v165_v34 = vpop.f32.mrb[7].mxu0 }
  0xe5   :  { %v166_v35 = vadd.f32 %v1078_v17, %v165_v34 }
  0xe6   :  { %v252_v36 = vadd.f32 %v248_v29, %v171_v33 }
  0xe8   :  { %1332 = vtanh.f32 %v252_v36  ;;  %v1088_v38 = vmul.f32 -1.442695, %v252_v36 }
  0xea   :  { %1334 = vpow2.f32 %v1088_v38 }
  0xf2   :  { %v1333_v37 = vpop.eup %1332 }
  0xf3   :  { %262 = vrot.lane.b32.xlu0 %v1333_v37, %s1423_s3 }
  0xf4   :  { %v1335_v39 = vpop.eup %1334 }
  0xf5   :  { %v256_v40 = vadd.f32 1.0, %v1335_v39 }
  0xf7   :  { %1336 = vrcp.f32 %v256_v40 }
 0x101   :  { %v1337_v41 = vpop.eup %1336 }
 0x102   :  { %v260_v44 = vmul.f32 0.0, %v1337_v41 }
 0x165   :  { %v263_v42 = vpop.permute.xlu0 %262 }
 0x166   :  { %v265_v43 = vmul.f32 %v1337_v41, %v263_v42 }
 0x168   :  { %267 = vrot.lane.b32.xlu0 %v265_v43, %s1424_s22 }
 0x1da   :  { %v268_v45 = vpop.permute.xlu0 %267 }
 0x1db   :  { %v270_v46 = vadd.f32 %v268_v45, %v260_v44 }
 0x1dd   :  { %1338 = vtanh.f32 %v270_v46 }
 0x1e7   :  { %v1339_v47 = vpop.eup %1338 }
 0x1e8   :  { %273 = vrot.lane.b32.xlu1 %v1339_v47, %s1423_s3 }
 0x25a   :  { %v274_v48 = vpop.permute.xlu1 %273 }
 0x25b   :  { %v276_v49 = vmul.f32 %v1337_v41, %v274_v48 }
 0x25d   :  { %278 = vrot.lane.b32.xlu1 %v276_v49, %s1424_s22 }
 0x2cf   :  { %v279_v50 = vpop.permute.xlu1 %278 }
 0x2d0   :  { %1193 = vmatmul.mubr.msk.f32.vlgmr.msra.gmra.mrb[2].mxu1 %vm178_vm3, %v279_v50 }
 0x2d1   :  { %1292 = vmatpush3.bf16.msra.mxu1 %v1482_v7  ;;  %1214 = vmatprep.mubr.msk.f32.mxu1 %vm1421_vm2, %v1422_v10 }
 0x2d2   :  { %1293 = vmatprep.subr.bf16.mxu1 %v1420_v5 }
 0x2d5   :  { %1295 = vmatpush3.bf16.msra.mxu1 %v1501_v13 }
 0x2d6   :  { %1302 = vmatprep.subr.bf16.mxu1 %v1420_v5 }
 0x3a3   :  { %v348_v51 = vpop.f32.mrb[2].mxu1 }
 0x3a4   :  { %v352_v52 = vadd.f32 %v348_v51, %v166_v35  ;;  %v1194_v53 = vpop.f32.mrb[3].mxu1 }
 0x3a6   :  { %1340 = vtanh.f32 %v352_v52  ;;  %v1090_v55 = vmul.f32 -1.442695, %v352_v52 }
 0x3a8   :  { %1342 = vpow2.f32 %v1090_v55 }
 0x3b0   :  { %v1341_v54 = vpop.eup %1340 }
 0x3b1   :  { %362 = vrot.lane.b32.xlu0 %v1341_v54, %s1423_s3 }
 0x3b2   :  { %v1343_v56 = vpop.eup %1342 }
 0x3b3   :  { %v356_v57 = vadd.f32 1.0, %v1343_v56 }
 0x3b5   :  { %1344 = vrcp.f32 %v356_v57 }
 0x3bf   :  { %v1345_v58 = vpop.eup %1344 }
 0x3c0   :  { %v360_v61 = vmul.f32 %v1345_v58, %v270_v46 }
 0x423   :  { %v363_v59 = vpop.permute.xlu0 %362 }
 0x424   :  { %v365_v60 = vmul.f32 %v1345_v58, %v363_v59 }
 0x426   :  { %367 = vrot.lane.b32.xlu1 %v365_v60, %s1424_s22 }
 0x498   :  { %v368_v62 = vpop.permute.xlu1 %367 }
 0x499   :  { %v370_v63 = vadd.f32 %v368_v62, %v360_v61 }
 0x49b   :  { %1346 = vtanh.f32 %v370_v63 }
 0x4a5   :  { %v1347_v0 = vpop.eup %1346 }
 0x4a6   :  { %373 = vrot.lane.b32.xlu0 %v1347_v0, %s1423_s3 }
 0x518   :  { %v374_v1 = vpop.permute.xlu0 %373 }
 0x519   :  { %v376_v2 = vmul.f32 %v1345_v58, %v374_v1 }
 0x51b   :  { %378 = vrot.lane.b32.xlu1 %v376_v2, %s1424_s22 }
 0x58d   :  { %v379_v3 = vpop.permute.xlu1 %378 }
 0x58e   :  { %1204 = vmatmul.mubr.msk.f32.vlgmr.msra.gmra.mrb[8].mxu0 %vm178_vm3, %v379_v3 }
 0x58f   :  { %1298 = vmatpush3.bf16.msra.mxu0 %v1482_v7  ;;  %1225 = vmatprep.mubr.msk.f32.mxu0 %vm1421_vm2, %v1422_v10 }
 0x590   :  { %1299 = vmatprep.subr.bf16.mxu0 %v1420_v5 }
 0x593   :  { %1301 = vmatpush3.bf16.msra.mxu0 %v1501_v13 }
 0x594   :  { %1308 = vmatprep.subr.bf16.mxu0 %v1420_v5 }
 0x661   :  { %v448_v4 = vpop.f32.mrb[8].mxu0 }
 0x662   :  { %v452_v6 = vadd.f32 %v448_v4, %v1544_v27  ;;  %v1205_v8 = vpop.f32.mrb[9].mxu0 }
 0x664   :  { %1348 = vtanh.f32 %v452_v6  ;;  %v1092_v11 = vmul.f32 -1.442695, %v452_v6 }
 0x666   :  { %1350 = vpow2.f32 %v1092_v11 }
 0x66e   :  { %v1349_v9 = vpop.eup %1348 }
 0x66f   :  { %462 = vrot.lane.b32.xlu0 %v1349_v9, %s1423_s3 }
 0x670   :  { %v1351_v12 = vpop.eup %1350 }
 0x671   :  { %v456_v14 = vadd.f32 1.0, %v1351_v12 }
 0x673   :  { %1352 = vrcp.f32 %v456_v14 }
 0x67d   :  { %v1353_v15 = vpop.eup %1352 }
 0x67e   :  { %v460_v18 = vmul.f32 %v1353_v15, %v370_v63 }
 0x6e1   :  { %v463_v16 = vpop.permute.xlu0 %462 }
 0x6e2   :  { %v465_v17 = vmul.f32 %v1353_v15, %v463_v16 }
 0x6e4   :  { %467 = vrot.lane.b32.xlu1 %v465_v17, %s1424_s22 }
 0x756   :  { %v468_v20 = vpop.permute.xlu1 %467 }
 0x757   :  { %v470_v22 = vadd.f32 %v468_v20, %v460_v18 }
 0x759   :  { %1354 = vtanh.f32 %v470_v22 }
 0x763   :  { %v1355_v24 = vpop.eup %1354 }
 0x764   :  { %473 = vrot.lane.b32.xlu0 %v1355_v24, %s1423_s3 }
 0x7d6   :  { %v474_v26 = vpop.permute.xlu0 %473 }
 0x7d7   :  { %v476_v27 = vmul.f32 %v1353_v15, %v474_v26 }
 0x7d9   :  { %478 = vrot.lane.b32.xlu1 %v476_v27, %s1424_s22 }
 0x84b   :  { %v479_v28 = vpop.permute.xlu1 %478 }
 0x84c   :  { %1215 = vmatmul.mubr.msk.f32.vlgmr.msra.gmra.mrb[4].mxu1 %vm178_vm3, %v479_v28 }
 0x84d   :  { %1304 = vmatpush3.bf16.msra.mxu1 %v1482_v7  ;;  %1236 = vmatprep.mubr.msk.f32.mxu1 %vm1421_vm2, %v1422_v10 }
 0x84e   :  { %1305 = vmatprep.subr.bf16.mxu1 %v1420_v5 }
 0x851   :  { %1307 = vmatpush3.bf16.msra.mxu1 %v1501_v13 }
 0x852   :  { %1314 = vmatprep.subr.bf16.mxu1 %v1420_v5 }
 0x91f   :  { %v548_v29 = vpop.f32.mrb[4].mxu1 }
 0x920   :  { %v552_v31 = vadd.f32 %v548_v29, %v1546_v30  ;;  %v1216_v32 = vpop.f32.mrb[5].mxu1 }
 0x922   :  { %1356 = vtanh.f32 %v552_v31  ;;  %v1094_v34 = vmul.f32 -1.442695, %v552_v31 }
 0x924   :  { %1358 = vpow2.f32 %v1094_v34 }
 0x92c   :  { %v1357_v33 = vpop.eup %1356 }
 0x92d   :  { %562 = vrot.lane.b32.xlu0 %v1357_v33, %s1423_s3 }
 0x92e   :  { %v1359_v35 = vpop.eup %1358 }
 0x92f   :  { %v556_v36 = vadd.f32 1.0, %v1359_v35 }
 0x931   :  { %1360 = vrcp.f32 %v556_v36 }
 0x93b   :  { %v1361_v37 = vpop.eup %1360 }
 0x93c   :  { %v560_v40 = vmul.f32 %v1361_v37, %v470_v22 }
 0x99f   :  { %v563_v38 = vpop.permute.xlu0 %562 }
 0x9a0   :  { %v565_v39 = vmul.f32 %v1361_v37, %v563_v38 }
 0x9a2   :  { %567 = vrot.lane.b32.xlu1 %v565_v39, %s1424_s22 }
 0xa14   :  { %v568_v41 = vpop.permute.xlu1 %567 }
 0xa15   :  { %v570_v42 = vadd.f32 %v568_v41, %v560_v40 }
 0xa17   :  { %1362 = vtanh.f32 %v570_v42 }
 0xa21   :  { %v1363_v30 = vpop.eup %1362 }
 0xa22   :  { %573 = vrot.lane.b32.xlu0 %v1363_v30, %s1423_s3 }
 0xa94   :  { %v574_v43 = vpop.permute.xlu0 %573 }
 0xa95   :  { %v576_v44 = vmul.f32 %v1361_v37, %v574_v43 }
 0xa97   :  { %578 = vrot.lane.b32.xlu1 %v576_v44, %s1424_s22 }
 0xb09   :  { %v579_v45 = vpop.permute.xlu1 %578 }
 0xb0a   :  { %1226 = vmatmul.mubr.msk.f32.vlgmr.msra.gmra.mrb[10].mxu0 %vm178_vm3, %v579_v45 }
 0xb0b   :  { %1310 = vmatpush3.bf16.msra.mxu0 %v1482_v7  ;;  %1247 = vmatprep.mubr.msk.f32.mxu0 %vm1421_vm2, %v1422_v10 }
 0xb0c   :  { %1311 = vmatprep.subr.bf16.mxu0 %v1420_v5 }
 0xb0f   :  { %1313 = vmatpush3.bf16.msra.mxu0 %v1501_v13 }
 0xb10   :  { %1320 = vmatprep.subr.bf16.mxu0 %v1420_v5 }
 0xbdd   :  { %v648_v46 = vpop.f32.mrb[10].mxu0 }
 0xbde   :  { %v652_v47 = vadd.f32 %v648_v46, %v1540_v23  ;;  %v1227_v48 = vpop.f32.mrb[11].mxu0 }
 0xbdf   :  { %v978_v48 = vld [vmem:[%s1657_s4 + $0x8] sm:$0xff] }
 0xbe0   :  { %1364 = vtanh.f32 %v652_v47  ;;  %v1096_v50 = vmul.f32 -1.442695, %v652_v47 }
 0xbe2   :  { %1366 = vpow2.f32 %v1096_v50 }
 0xbea   :  { %v1365_v49 = vpop.eup %1364 }
 0xbeb   :  { %662 = vrot.lane.b32.xlu0 %v1365_v49, %s1423_s3  ;;  %v979_v49 = vld [vmem:[%s1657_s4 + $0x10] sm:$0xff] }
 0xbec   :  { %v1367_v51 = vpop.eup %1366 }
 0xbed   :  { %v656_v52 = vadd.f32 1.0, %v1367_v51  ;;  %v980_v51 = vld [vmem:[%s1657_s4 + $0x18] sm:$0xff] }
 0xbef   :  { %1368 = vrcp.f32 %v656_v52  ;;  %v1324_v52 = vpack.c.bf16 %v980_v51, %v979_v49 }
 0xbf9   :  { %v1369_v53 = vpop.eup %1368 }
 0xbfa   :  { %v660_v56 = vmul.f32 %v1369_v53, %v570_v42 }
 0xc5d   :  { %v663_v54 = vpop.permute.xlu0 %662 }
 0xc5e   :  { %v665_v55 = vmul.f32 %v1369_v53, %v663_v54 }
 0xc60   :  { %667 = vrot.lane.b32.xlu1 %v665_v55, %s1424_s22 }
 0xcd2   :  { %v668_v57 = vpop.permute.xlu1 %667 }
 0xcd3   :  { %v670_v58 = vadd.f32 %v668_v57, %v660_v56  ;;  %v1103_v57 = vld [vmem:[%s1658_s5] ss:$0 sm:$0xff] }
 0xcd5   :  { %1370 = vtanh.f32 %v670_v58 }
 0xcdf   :  { %v1371_v23 = vpop.eup %1370 }
 0xce0   :  { %673 = vrot.lane.b32.xlu0 %v1371_v23, %s1423_s3 }
 0xd52   :  { %v674_v59 = vpop.permute.xlu0 %673 }
 0xd53   :  { %v676_v60 = vmul.f32 %v1369_v53, %v674_v59 }
 0xd55   :  { %678 = vrot.lane.b32.xlu1 %v676_v60, %s1424_s22 }
 0xdc7   :  { %v679_v61 = vpop.permute.xlu1 %678 }
 0xdc8   :  { %1237 = vmatmul.mubr.msk.f32.vlgmr.msra.gmra.mrb[6].mxu1 %vm178_vm3, %v679_v61 }
 0xdc9   :  { %1316 = vmatpush3.bf16.msra.mxu1 %v1482_v7  ;;  %1258 = vmatprep.mubr.msk.f32.mxu1 %vm1421_vm2, %v1422_v10 }
 0xdca   :  { %1317 = vmatprep.subr.bf16.mxu1 %v1420_v5 }
 0xdcd   :  { %1319 = vmatpush3.bf16.msra.mxu1 %v1501_v13 }
 0xe9b   :  { %v748_v62 = vpop.f32.mrb[6].mxu1 }
 0xe9c   :  { %v752_v63 = vadd.f32 %v748_v62, %v1542_v25  ;;  %v1238_v0 = vpop.f32.mrb[7].mxu1 }
 0xe9e   :  { %1372 = vtanh.f32 %v752_v63  ;;  %v1098_v2 = vmul.f32 -1.442695, %v752_v63 }
 0xea0   :  { %1374 = vpow2.f32 %v1098_v2 }
 0xea8   :  { %v1373_v1 = vpop.eup %1372 }
 0xea9   :  { %762 = vrot.lane.b32.xlu0 %v1373_v1, %s1423_s3 }
 0xeaa   :  { %v1375_v3 = vpop.eup %1374 }
 0xeab   :  { %v756_v4 = vadd.f32 1.0, %v1375_v3 }
 0xead   :  { %1376 = vrcp.f32 %v756_v4 }
 0xeb7   :  { %v1377_v7 = vpop.eup %1376 }
 0xeb8   :  { %v760_v9 = vmul.f32 %v1377_v7, %v670_v58 }
 0xf1b   :  { %v763_v6 = vpop.permute.xlu0 %762 }
 0xf1c   :  { %v765_v8 = vmul.f32 %v1377_v7, %v763_v6 }
 0xf1e   :  { %767 = vrot.lane.b32.xlu1 %v765_v8, %s1424_s22 }
 0xf90   :  { %v768_v13 = vpop.permute.xlu1 %767 }
 0xf91   :  { %v770_v11 = vadd.f32 %v768_v13, %v760_v9 }
 0xf93   :  { %1378 = vtanh.f32 %v770_v11 }
 0xf9d   :  { %v1379_v25 = vpop.eup %1378 }
 0xf9e   :  { %773 = vrot.lane.b32.xlu0 %v1379_v25, %s1423_s3 }
0x1010   :  { %v774_v12 = vpop.permute.xlu0 %773 }
0x1011   :  { %v776_v14 = vmul.f32 %v1377_v7, %v774_v12 }
0x1013   :  { %778 = vrot.lane.b32.xlu1 %v776_v14, %s1424_s22 }
0x1085   :  { %v779_v15 = vpop.permute.xlu1 %778 }
0x1086   :  { %1248 = vmatmul.mubr.msk.f32.vlgmr.msra.gmra.mrb[12].mxu0 %vm178_vm3, %v779_v15 }
0x1087   :  { %1269 = vmatprep.mubr.msk.f32.mxu0 %vm1421_vm2, %v1422_v10 }
0x1159   :  { %v848_v16 = vpop.f32.mrb[12].mxu0 }
0x115a   :  { %v852_v17 = vadd.f32 %v848_v16, %v1536_v19  ;;  %v1249_v18 = vpop.f32.mrb[13].mxu0 }
0x115c   :  { %1380 = vtanh.f32 %v852_v17  ;;  %v1100_v22 = vmul.f32 -1.442695, %v852_v17 }
0x115e   :  { %1382 = vpow2.f32 %v1100_v22 }
0x1166   :  { %v1381_v20 = vpop.eup %1380 }
0x1167   :  { %862 = vrot.lane.b32.xlu0 %v1381_v20, %s1423_s3 }
0x1168   :  { %v1383_v24 = vpop.eup %1382 }
0x1169   :  { %v856_v26 = vadd.f32 1.0, %v1383_v24 }
0x116b   :  { %1384 = vrcp.f32 %v856_v26 }
0x1175   :  { %v1385_v27 = vpop.eup %1384 }
0x1176   :  { %v860_v31 = vmul.f32 %v1385_v27, %v770_v11 }
0x11d9   :  { %v863_v28 = vpop.permute.xlu0 %862 }
0x11da   :  { %v865_v29 = vmul.f32 %v1385_v27, %v863_v28 }
0x11dc   :  { %867 = vrot.lane.b32.xlu1 %v865_v29, %s1424_s22 }
0x124e   :  { %v868_v10 = vpop.permute.xlu1 %867 }
0x124f   :  { %v870_v32 = vadd.f32 %v868_v10, %v860_v31 }
0x1251   :  { %1386 = vtanh.f32 %v870_v32 }
0x125b   :  { %v1387_v19 = vpop.eup %1386 }
0x125c   :  { %873 = vrot.lane.b32.xlu0 %v1387_v19, %s1423_s3 }
0x12ce   :  { %v874_v33 = vpop.permute.xlu0 %873 }
0x12cf   :  { %v876_v34 = vmul.f32 %v1385_v27, %v874_v33 }
0x12d1   :  { %878 = vrot.lane.b32.xlu1 %v876_v34, %s1424_s22 }
0x1343   :  { %v879_v35 = vpop.permute.xlu1 %878 }
0x1344   :  { %1259 = vmatmul.mubr.msk.f32.vlgmr.msra.gmra.mrb[8].mxu1 %vm178_vm3, %v879_v35 }
0x1417   :  { %v948_v36 = vpop.f32.mrb[8].mxu1 }
0x1418   :  { %v952_v37 = vadd.f32 %v948_v36, %v1538_v21  ;;  %v1260_v38 = vpop.f32.mrb[9].mxu1  ;;  %v977_v21 = vld [vmem:[%s1657_s4] sm:$0xff]  ;;  %s1425_s4 = smov [#allocation2]  }
0x1419   :  { %v1321_v50 = vpack.c.bf16 %v978_v48, %v977_v21  ;;  %s1070_s8 = sshll.u32 %s1425_s4, 4  ;;  %s1071_s8 = int_to_ptr.vmem [resolvable:$true] %s1070_s8 }
0x141a   :  { %1388 = vtanh.f32 %v952_v37  ;;  %v1102_v40 = vmul.f32 -1.442695, %v952_v37  ;;  %s1396_s9 = scalar_lea.vmem %s1071_s8, 128  ;;  %p1401_p1 = scmp.lt.s32.totalorder %s1071_s8, %s1071_s8 }
0x141b   :  { %1322 = vmatpush3.bf16.msra.mxu0 %v1321_v50  ;;  %p1397_p0 = scmp.ne.s32.totalorder %s1071_s8, %s1396_s9  ;;  %p1402_p2 = scmp.lt.s32.totalorder %s1396_s9, %s1396_s9 }
0x141c   :  { %1390 = vpow2.f32 %v1102_v40  ;;  %1323 = vmatprep.subr.bf16.mxu0 %v1420_v5 }
0x141d   :  { %p1403_p3 = por %p1402_p2, %p1401_p1 }
0x141f   :  { %1325 = vmatpush3.bf16.msra.mxu0 %v1324_v52  ;;  %p1404_p4 = pnand %p1403_p3, %p1397_p0 }
0x1424   :  { %v1389_v39 = vpop.eup %1388 }
0x1425   :  { %962 = vrot.lane.b32.xlu0 %v1389_v39, %s1423_s3 }
0x1426   :  { %v1391_v41 = vpop.eup %1390 }
0x1427   :  { %v956_v42 = vadd.f32 1.0, %v1391_v41 }
0x1429   :  { %1392 = vrcp.f32 %v956_v42 }
0x1433   :  { %v1393_v30 = vpop.eup %1392 }
0x1434   :  { %v960_v45 = vmul.f32 %v1393_v30, %v870_v32 }
0x1497   :  { %v963_v43 = vpop.permute.xlu0 %962 }
0x1498   :  { %v965_v44 = vmul.f32 %v1393_v30, %v963_v43 }
0x149a   :  { %967 = vrot.lane.b32.xlu1 %v965_v44, %s1424_s22 }
0x150c   :  { %v968_v46 = vpop.permute.xlu1 %967 }
0x150d   :  { %v970_v47 = vadd.f32 %v968_v46, %v960_v45 }
0x150f   :  { %1394 = vtanh.f32 %v970_v47 }
0x1519   :  { %v1395_v53 = vpop.eup %1394 }
0x151a   :  { %973 = vrot.lane.b32.xlu0 %v1395_v53, %s1423_s3 }
0x158c   :  { %v974_v54 = vpop.permute.xlu0 %973 }
0x158d   :  { %v976_v55 = vmul.f32 %v1393_v30, %v974_v54 }
0x158f   :  { %989 = vrot.lane.b32.xlu1 %v976_v55, %s1424_s22 }
0x1601   :  { %v990_v56 = vpop.permute.xlu1 %989 }
0x1602   :  { %1270 = vmatmul.mubr.msk.f32.vlgmr.msra.gmra.mrb[14].mxu0 %vm178_vm3, %v990_v56 }
0x16d5   :  { %v1059_v58 = vpop.f32.mrb[14].mxu0 }
0x16d6   :  { %v1060_v23 = vadd.f32 %v1103_v57, %v1059_v58  ;;  %v1271_v5 = vpop.f32.mrb[15].mxu0 }
0x16d8   :  { %1063 = vst [vmem:[#allocation2] sm:$0xff] %v1060_v23 }
0x16d9   :  { %1407 = shalt.err (!%p1404_p4)
}
0x16da   :  { %s1408_s12 = scalar_lea.hbm %s1659_s6, 128 }
0x16db   :  { %p1409_p5 = scmp.ne.s32.totalorder %s1659_s6, %s1408_s12  ;;  %p1412_p6 = scmp.lt.u32.totalorder %s1408_s12, %s1659_s6 }
0x16dd   :  { %p1414_p7 = pnand %p1412_p6, %p1409_p5 }
0x16df   :  { %1417 = shalt.err (!%p1414_p7)
}
0x16e0   :  { %1073 = dma.vmem_to_hbm [thread:$0]  %s1071_s8, 128, %s1659_s6, [#allocation3]  }
0x16e1   :  { %1418 = dma.done.wait [#allocation3], 128  }
0x16e2   :  { %1419 = vsyncadd [#allocation3], 4294967168 }
0x16e3   :  { %1077 = vsyncpa [#allocation3], 1 }

</bundles_post_ra>
